<compile_context>
chip_gen: v5e
topology: v5e:2x2
jax: 0.10.0
libtpu: 0.0.40
codegen_flags: <defaults>
</compile_context>

<pallas_src>
import functools

import jax
import jax.numpy as jnp
from jax import lax
from jax.experimental import pallas as pl
from jax.experimental.pallas import tpu as pltpu

_DIST_ORDER = ["sin", "tanh", "log", "relu", "sigmoid"]
_LANE = 128


def _round_up(x, m):
    return (x + m - 1) // m * m


def _build_fused_kernel(layer_acts, width):
    """Fused forward kernel: all mixed layers + final linear on one row tile.

    layer_acts: tuple per layer of (act_name, col_start, col_end) blocks
                (static -> baked into the trace; only present activations are
                 computed, padded columns get no activation and stay zero).
    width:      lane-padded feature width (multiple of 128) shared by all layers.
    """
    n_layers = len(layer_acts)

    def kernel(*refs):
        # refs = (x, w0, a0, w1, a1, ..., w_linear, bias, out)
        x_ref = refs[0]
        wl_ref = refs[1 + 2 * n_layers]
        b_ref = refs[2 + 2 * n_layers]
        o_ref = refs[3 + 2 * n_layers]

        col = lax.broadcasted_iota(jnp.int32, (1, width), 1)
        h = x_ref[...]                                   # (tile_rows, width) f32
        for li in range(n_layers):
            w_ref = refs[1 + 2 * li]
            a_ref = refs[2 + 2 * li]
            y = jnp.dot(h, w_ref[...], preferred_element_type=jnp.float32)
            out = y
            for name, start, end in layer_acts[li]:
                if name == "sin":
                    v = jnp.sin(y)
                elif name == "tanh":
                    v = jnp.tanh(y)
                elif name == "log":
                    # torch.log(torch.pow(s, 2)) == 2*log(|s|); avoids y*y underflow.
                    v = 2.0 * jnp.log(jnp.abs(y))
                elif name == "relu":
                    v = jnp.maximum(y, 0.0)
                elif name == "sigmoid":
                    v = jax.nn.sigmoid(y)
                else:
                    continue  # identity block: leave y untouched
                mask = (col >= start) & (col < end)
                out = jnp.where(mask, v, out)
            h = out * a_ref[...]                         # NodesLayer alpha scale
        o_ref[...] = (jnp.dot(h, wl_ref[...], preferred_element_type=jnp.float32)
                      + b_ref[...])

    return kernel


def make_mixed_net_forward(input_size, output_size, layers, distributions=None,
                           dist_order=_DIST_ORDER):
    """Returns a jitted forward(x, params) for a fixed MixedNet architecture."""
    dists = ([list(d) for d in distributions] if distributions is not None
             else [[l] for l in layers])
    layer_acts = []
    for i, l in enumerate(layers):
        assert sum(dists[i]) == l, f"distribution at layer {i+1} != layer size"
        assert len(dists[i]) <= len(dist_order)
        blocks, start = [], 0
        for j, sz in enumerate(dists[i]):
            blocks.append((dist_order[j], start, start + sz))
            start += sz
        layer_acts.append(tuple(blocks))
    layer_acts = tuple(layer_acts)
    n_layers = len(layers)
    width = _round_up(max([input_size, output_size] + list(layers)), _LANE)
    kernel = _build_fused_kernel(layer_acts, width)

    def forward(x, params):
        b, s, _ = x.shape
        n = b * s
        # Row tiling: multiple of 8 sublanes, cap per-tile VMEM (512*128*f32=256KiB
        # per buffer, comfortably inside even the v7x 32 MiB scoped budget).
        tile = min(512, _round_up(max(n, 1), 8))
        n_pad = _round_up(n, tile)

        x2d = x.reshape(n, -1).astype(jnp.float32)
        x_pad = jnp.zeros((n_pad, width), jnp.float32).at[:n, :input_size].set(x2d)

        def pad_w(w):
            w = w.astype(jnp.float32)
            return jnp.zeros((width, width), jnp.float32).at[:w.shape[0],
                                                             :w.shape[1]].set(w)

        def pad_v(v):
            v = v.astype(jnp.float32)
            return jnp.zeros((1, width), jnp.float32).at[0, :v.shape[0]].set(v)

        resident = lambda i: (0, 0)
        operands = [x_pad]
        in_specs = [pl.BlockSpec((tile, width), lambda i: (i, 0))]
        for w, a in zip(params["transitions"], params["alphas"]):
            operands += [pad_w(w), pad_v(a)]
            in_specs += [pl.BlockSpec((width, width), resident),
                         pl.BlockSpec((1, width), resident)]
        operands += [pad_w(params["linear_w"]), pad_v(params["linear_b"])]
        in_specs += [pl.BlockSpec((width, width), resident),
                     pl.BlockSpec((1, width), resident)]

        flops = 2 * n_pad * width * width * (n_layers + 1)
        transcendentals = n_pad * width * sum(
            sum(1 for nm, _, _ in la if nm in ("sin", "tanh", "log", "sigmoid"))
            for la in layer_acts)
        bytes_accessed = 4 * (2 * n_pad * width
                              + (n_layers + 1) * width * width
                              + (n_layers + 1) * width)

        out_pad = pl.pallas_call(
            kernel,
            out_shape=jax.ShapeDtypeStruct((n_pad, width), jnp.float32),
            grid=(n_pad // tile,),
            in_specs=in_specs,
            out_specs=pl.BlockSpec((tile, width), lambda i: (i, 0)),
            compiler_params=pltpu.CompilerParams(
                dimension_semantics=("parallel",)),
            cost_estimate=pl.CostEstimate(flops=flops,
                                          transcendentals=transcendentals,
                                          bytes_accessed=bytes_accessed),
        )(*operands)

        return out_pad[:n, :output_size].reshape(b, s, output_size)

    return jax.jit(forward)


def init_mixed_net(key, input_size, output_size, layers, distributions=None,
                   dist_order=_DIST_ORDER):
    """Deterministic parameter init mirroring MixedNet.__init__ shapes."""
    if distributions is None:
        distributions = [[l] for l in layers]
    params = {"transitions": [], "alphas": []}
    last = input_size
    for i, l in enumerate(layers):
        assert sum(distributions[i]) == l
        assert len(distributions[i]) <= len(dist_order)
        key, k_a, k_t = jax.random.split(key, 3)
        params["alphas"].append(jax.random.uniform(k_a, (l,), jnp.float32))
        params["transitions"].append(
            jax.random.uniform(k_t, (last, l), jnp.float32))
        last = l
    key, k_w, k_b = jax.random.split(key, 3)
    bound = 1.0 / float(last) ** 0.5
    # nn.Linear default init U(-1/sqrt(in), 1/sqrt(in)); stored transposed (in, out)
    params["linear_w"] = jax.random.uniform(k_w, (last, output_size), jnp.float32,
                                            -bound, bound)
    params["linear_b"] = jax.random.uniform(k_b, (output_size,), jnp.float32,
                                            -bound, bound)
    return params


def mixed_net_reference(x, params, layers, distributions=None,
                        dist_order=_DIST_ORDER):
    """Pure-JAX f32 reference of MixedNet.forward (for offline validation)."""
    dists = distributions if distributions is not None else [[l] for l in layers]
    b, s, _ = x.shape
    h = x.reshape(b * s, -1).astype(jnp.float32)
    for i, (w, a) in enumerate(zip(params["transitions"], params["alphas"])):
        y = h @ w.astype(jnp.float32)
        pieces, start = [], 0
        for j, sz in enumerate(dists[i]):
            seg = y[:, start:start + sz]
            name = dist_order[j]
            if name == "sin":
                seg = jnp.sin(seg)
            elif name == "tanh":
                seg = jnp.tanh(seg)
            elif name == "log":
                seg = jnp.log(seg * seg)
            elif name == "relu":
                seg = jnp.maximum(seg, 0.0)
            elif name == "sigmoid":
                seg = jax.nn.sigmoid(seg)
            pieces.append(seg)
            start += sz
        h = jnp.concatenate(pieces, axis=-1) * a
    out = h @ params["linear_w"] + params["linear_b"]
    return out.reshape(b, s, -1)


if __name__ == "__main__":
    key = jax.random.PRNGKey(0)

    batch, seq = 2, 8
    input_size, output_size = 32, 16
    layers = [64, 48]
    # layer 0: sin on first 32 cols, tanh on next 32
    # layer 1: sin / tanh / log(x^2) on 16 cols each
    distributions = [[32, 32], [16, 16, 16]]

    k_params, k_x = jax.random.split(key)
    params = init_mixed_net(k_params, input_size, output_size, layers,
                            distributions)
    x = jax.random.uniform(k_x, (batch, seq, input_size), jnp.float32)

    forward = make_mixed_net_forward(input_size, output_size, layers,
                                     distributions)
    out = forward(x, params)
    jax.block_until_ready(out)
    assert out.shape == (batch, seq, output_size), out.shape
    print("KERNEL_OK")
</pallas_src>

<mosaic_0001>
module attributes {stable_mosaic.version = 11 : i64} {
  func.func @kernel(%arg0: i32, %arg1: memref<16x128xf32, #tpu.memory_space<vmem>>, %arg2: memref<128x128xf32, #tpu.memory_space<vmem>>, %arg3: memref<1x128xf32, #tpu.memory_space<vmem>>, %arg4: memref<128x128xf32, #tpu.memory_space<vmem>>, %arg5: memref<1x128xf32, #tpu.memory_space<vmem>>, %arg6: memref<128x128xf32, #tpu.memory_space<vmem>>, %arg7: memref<1x128xf32, #tpu.memory_space<vmem>>, %arg8: memref<16x128xf32, #tpu.memory_space<vmem>>) attributes {dimension_semantics = [#tpu.dimension_semantics<parallel>], iteration_bounds = array<i64: 1>, scalar_prefetch = 0 : i64, scratch_operands = 0 : i64, tpu.core_type = #tpu.core_type<tc>, window_params = [{transform_indices = @transform_0, window_bounds = array<i64: 16, 128>}, {pipeline_mode = #tpu.pipeline_mode<synchronous>, transform_indices = @transform_1, window_bounds = array<i64: 128, 128>}, {pipeline_mode = #tpu.pipeline_mode<synchronous>, transform_indices = @transform_2, window_bounds = array<i64: 1, 128>}, {pipeline_mode = #tpu.pipeline_mode<synchronous>, transform_indices = @transform_3, window_bounds = array<i64: 128, 128>}, {pipeline_mode = #tpu.pipeline_mode<synchronous>, transform_indices = @transform_4, window_bounds = array<i64: 1, 128>}, {pipeline_mode = #tpu.pipeline_mode<synchronous>, transform_indices = @transform_5, window_bounds = array<i64: 128, 128>}, {pipeline_mode = #tpu.pipeline_mode<synchronous>, transform_indices = @transform_6, window_bounds = array<i64: 1, 128>}, {transform_indices = @transform_7, window_bounds = array<i64: 16, 128>}]} {
    %0 = tpu.iota {dimensions = array<i32: 1>} : vector<1x128xi32>
    %c0 = arith.constant 0 : index
    %c0_0 = arith.constant 0 : index
    %1 = vector.load %arg1[%c0, %c0_0] : memref<16x128xf32, #tpu.memory_space<vmem>>, vector<16x128xf32>
    %c0_1 = arith.constant 0 : index
    %c0_2 = arith.constant 0 : index
    %2 = vector.load %arg2[%c0_1, %c0_2] : memref<128x128xf32, #tpu.memory_space<vmem>>, vector<128x128xf32>
    %cst = arith.constant dense<0.000000e+00> : vector<16x128xf32>
    %3 = tpu.matmul %1, %2, %cst {dimension_numbers = #tpu.dot_dimension_numbers<[1], [0], [0], [1], [0, 0, 1, 1], [], []>} : vector<16x128xf32>, vector<128x128xf32>, vector<16x128xf32> -> vector<16x128xf32>
    %4 = math.sin %3 : vector<16x128xf32>
    %c0_i32 = arith.constant 0 : i32
    %5 = vector.broadcast %c0_i32 : i32 to vector<1x128xi32>
    %6 = arith.cmpi sge, %0, %5 : vector<1x128xi32>
    %c32_i32 = arith.constant 32 : i32
    %7 = vector.broadcast %c32_i32 : i32 to vector<1x128xi32>
    %8 = arith.cmpi slt, %0, %7 : vector<1x128xi32>
    %9 = arith.andi %6, %8 : vector<1x128xi1>
    %10 = vector.shape_cast %9 : vector<1x128xi1> to vector<1x128xi1>
    %11 = vector.broadcast %10 : vector<1x128xi1> to vector<16x128xi1>
    %12 = arith.select %11, %4, %3 : vector<16x128xi1>, vector<16x128xf32>
    %13 = math.tanh %3 : vector<16x128xf32>
    %c32_i32_3 = arith.constant 32 : i32
    %14 = vector.broadcast %c32_i32_3 : i32 to vector<1x128xi32>
    %15 = arith.cmpi sge, %0, %14 : vector<1x128xi32>
    %c64_i32 = arith.constant 64 : i32
    %16 = vector.broadcast %c64_i32 : i32 to vector<1x128xi32>
    %17 = arith.cmpi slt, %0, %16 : vector<1x128xi32>
    %18 = arith.andi %15, %17 : vector<1x128xi1>
    %19 = vector.shape_cast %18 : vector<1x128xi1> to vector<1x128xi1>
    %20 = vector.broadcast %19 : vector<1x128xi1> to vector<16x128xi1>
    %21 = arith.select %20, %13, %12 : vector<16x128xi1>, vector<16x128xf32>
    %c0_4 = arith.constant 0 : index
    %c0_5 = arith.constant 0 : index
    %22 = vector.load %arg3[%c0_4, %c0_5] : memref<1x128xf32, #tpu.memory_space<vmem>>, vector<1x128xf32>
    %23 = vector.broadcast %22 : vector<1x128xf32> to vector<16x128xf32>
    %24 = arith.mulf %21, %23 : vector<16x128xf32>
    %c0_6 = arith.constant 0 : index
    %c0_7 = arith.constant 0 : index
    %25 = vector.load %arg4[%c0_6, %c0_7] : memref<128x128xf32, #tpu.memory_space<vmem>>, vector<128x128xf32>
    %cst_8 = arith.constant dense<0.000000e+00> : vector<16x128xf32>
    %26 = tpu.matmul %24, %25, %cst_8 {dimension_numbers = #tpu.dot_dimension_numbers<[1], [0], [0], [1], [0, 0, 1, 1], [], []>} : vector<16x128xf32>, vector<128x128xf32>, vector<16x128xf32> -> vector<16x128xf32>
    %27 = math.sin %26 : vector<16x128xf32>
    %c0_i32_9 = arith.constant 0 : i32
    %28 = vector.broadcast %c0_i32_9 : i32 to vector<1x128xi32>
    %29 = arith.cmpi sge, %0, %28 : vector<1x128xi32>
    %c16_i32 = arith.constant 16 : i32
    %30 = vector.broadcast %c16_i32 : i32 to vector<1x128xi32>
    %31 = arith.cmpi slt, %0, %30 : vector<1x128xi32>
    %32 = arith.andi %29, %31 : vector<1x128xi1>
    %33 = vector.shape_cast %32 : vector<1x128xi1> to vector<1x128xi1>
    %34 = vector.broadcast %33 : vector<1x128xi1> to vector<16x128xi1>
    %35 = arith.select %34, %27, %26 : vector<16x128xi1>, vector<16x128xf32>
    %36 = math.tanh %26 : vector<16x128xf32>
    %c16_i32_10 = arith.constant 16 : i32
    %37 = vector.broadcast %c16_i32_10 : i32 to vector<1x128xi32>
    %38 = arith.cmpi sge, %0, %37 : vector<1x128xi32>
    %c32_i32_11 = arith.constant 32 : i32
    %39 = vector.broadcast %c32_i32_11 : i32 to vector<1x128xi32>
    %40 = arith.cmpi slt, %0, %39 : vector<1x128xi32>
    %41 = arith.andi %38, %40 : vector<1x128xi1>
    %42 = vector.shape_cast %41 : vector<1x128xi1> to vector<1x128xi1>
    %43 = vector.broadcast %42 : vector<1x128xi1> to vector<16x128xi1>
    %44 = arith.select %43, %36, %35 : vector<16x128xi1>, vector<16x128xf32>
    %45 = math.absf %26 : vector<16x128xf32>
    %46 = math.log %45 : vector<16x128xf32>
    %cst_12 = arith.constant 2.000000e+00 : f32
    %47 = vector.broadcast %cst_12 : f32 to vector<16x128xf32>
    %48 = arith.mulf %47, %46 : vector<16x128xf32>
    %c32_i32_13 = arith.constant 32 : i32
    %49 = vector.broadcast %c32_i32_13 : i32 to vector<1x128xi32>
    %50 = arith.cmpi sge, %0, %49 : vector<1x128xi32>
    %c48_i32 = arith.constant 48 : i32
    %51 = vector.broadcast %c48_i32 : i32 to vector<1x128xi32>
    %52 = arith.cmpi slt, %0, %51 : vector<1x128xi32>
    %53 = arith.andi %50, %52 : vector<1x128xi1>
    %54 = vector.shape_cast %53 : vector<1x128xi1> to vector<1x128xi1>
    %55 = vector.broadcast %54 : vector<1x128xi1> to vector<16x128xi1>
    %56 = arith.select %55, %48, %44 : vector<16x128xi1>, vector<16x128xf32>
    %c0_14 = arith.constant 0 : index
    %c0_15 = arith.constant 0 : index
    %57 = vector.load %arg5[%c0_14, %c0_15] : memref<1x128xf32, #tpu.memory_space<vmem>>, vector<1x128xf32>
    %58 = vector.broadcast %57 : vector<1x128xf32> to vector<16x128xf32>
    %59 = arith.mulf %56, %58 : vector<16x128xf32>
    %c0_16 = arith.constant 0 : index
    %c0_17 = arith.constant 0 : index
    %60 = vector.load %arg6[%c0_16, %c0_17] : memref<128x128xf32, #tpu.memory_space<vmem>>, vector<128x128xf32>
    %cst_18 = arith.constant dense<0.000000e+00> : vector<16x128xf32>
    %61 = tpu.matmul %59, %60, %cst_18 {dimension_numbers = #tpu.dot_dimension_numbers<[1], [0], [0], [1], [0, 0, 1, 1], [], []>} : vector<16x128xf32>, vector<128x128xf32>, vector<16x128xf32> -> vector<16x128xf32>
    %c0_19 = arith.constant 0 : index
    %c0_20 = arith.constant 0 : index
    %62 = vector.load %arg7[%c0_19, %c0_20] : memref<1x128xf32, #tpu.memory_space<vmem>>, vector<1x128xf32>
    %63 = vector.broadcast %62 : vector<1x128xf32> to vector<16x128xf32>
    %64 = arith.addf %61, %63 : vector<16x128xf32>
    %c0_21 = arith.constant 0 : index
    %c0_22 = arith.constant 0 : index
    %65 = vector.load %arg8[%c0_21, %c0_22] : memref<16x128xf32, #tpu.memory_space<vmem>>, vector<16x128xf32>
    tpu.vector_store %arg8[%c0_21, %c0_22], %64 {strides = array<i32>} : memref<16x128xf32, #tpu.memory_space<vmem>>, vector<16x128xf32>,
    return
  }
  func.func @transform_0(%arg0: i32) -> (i32, i32) {
    %c0_i32 = arith.constant 0 : i32
    %c0_i32_0 = arith.constant 0 : i32
    return %arg0, %c0_i32 : i32, i32
  }
  func.func @transform_1(%arg0: i32) -> (i32, i32) {
    %c0_i32 = arith.constant 0 : i32
    %c0_i32_0 = arith.constant 0 : i32
    %c0_i32_1 = arith.constant 0 : i32
    return %c0_i32, %c0_i32_0 : i32, i32
  }
  func.func @transform_2(%arg0: i32) -> (i32, i32) {
    %c0_i32 = arith.constant 0 : i32
    %c0_i32_0 = arith.constant 0 : i32
    %c0_i32_1 = arith.constant 0 : i32
    return %c0_i32, %c0_i32_0 : i32, i32
  }
  func.func @transform_3(%arg0: i32) -> (i32, i32) {
    %c0_i32 = arith.constant 0 : i32
    %c0_i32_0 = arith.constant 0 : i32
    %c0_i32_1 = arith.constant 0 : i32
    return %c0_i32, %c0_i32_0 : i32, i32
  }
  func.func @transform_4(%arg0: i32) -> (i32, i32) {
    %c0_i32 = arith.constant 0 : i32
    %c0_i32_0 = arith.constant 0 : i32
    %c0_i32_1 = arith.constant 0 : i32
    return %c0_i32, %c0_i32_0 : i32, i32
  }
  func.func @transform_5(%arg0: i32) -> (i32, i32) {
    %c0_i32 = arith.constant 0 : i32
    %c0_i32_0 = arith.constant 0 : i32
    %c0_i32_1 = arith.constant 0 : i32
    return %c0_i32, %c0_i32_0 : i32, i32
  }
  func.func @transform_6(%arg0: i32) -> (i32, i32) {
    %c0_i32 = arith.constant 0 : i32
    %c0_i32_0 = arith.constant 0 : i32
    %c0_i32_1 = arith.constant 0 : i32
    return %c0_i32, %c0_i32_0 : i32, i32
  }
  func.func @transform_7(%arg0: i32) -> (i32, i32) {
    %c0_i32 = arith.constant 0 : i32
    %c0_i32_0 = arith.constant 0 : i32
    return %arg0, %c0_i32 : i32, i32
  }
}

</mosaic_0001>

<bundles_post_ra>
// kernel: forward.1
= control target key start
LH: loop header
LB: loop body
LE: loop exit
PB: predicated region body
PF: predicated region fallthrough
CT: control target
= control target key end

     0   :  { %v883_v38 = vmov 683565275   ;;  %v884_v40 = vmov 2475754826   ;;  %v885_v42 = vmov 2131351028   ;;  %s1502_s1 = inlined_call_operand.vmem [shape: f32[128,128], index: 1, kind: input, shape index: {}]   ;;  %s1503_s0 = inlined_call_operand.vmem [shape: f32[16,128], index: 0, kind: input, shape index: {}]   ;;  %s1504_s2 = inlined_call_operand.vmem [shape: f32[1,128], index: 2, kind: input, shape index: {}]   ;;  %s1505_s3 = inlined_call_operand.vmem [shape: f32[128,128], index: 3, kind: input, shape index: {}]   ;;  %s1506_s4 = inlined_call_operand.vmem [shape: f32[1,128], index: 4, kind: input, shape index: {}]   ;;  %s1507_s6 = inlined_call_operand.vmem [shape: f32[1,128], index: 6, kind: input, shape index: {}]   ;;  %s1508_s5 = inlined_call_operand.vmem [shape: f32[128,128], index: 5, kind: input, shape index: {}]   ;;  %s1509_s7 = inlined_call_operand.vmem [shape: f32[16,128], index: 7, kind: output, shape index: {}]  }
   0x1   :  { %v45_v0 = vld [vmem:[%s1502_s1 + $0x78] sm:$0xff]  ;;  %v44_v1 = vld [vmem:[%s1502_s1 + $0x70] sm:$0xff]  ;;  %v43_v2 = vld [vmem:[%s1502_s1 + $0x68] sm:$0xff]  ;;  %v886_v47 = vmov 2102212464  }
   0x2   :  { %46 = vmatpush.msra.mxu0 %v45_v0  ;;  %845 = vmatpush.msra.mxu3 %v45_v0  ;;  %v42_v3 = vld [vmem:[%s1502_s1 + $0x60] sm:$0xff]  ;;  %v41_v4 = vld [vmem:[%s1502_s1 + $0x58] sm:$0xff]  ;;  %v40_v5 = vld [vmem:[%s1502_s1 + $0x50] sm:$0xff]  ;;  %v887_v50 = vmov 920167782  }
   0x3   :  { %v39_v6 = vld [vmem:[%s1502_s1 + $0x48] sm:$0xff]  ;;  %v38_v7 = vld [vmem:[%s1502_s1 + $0x40] sm:$0xff]  ;;  %v37_v8 = vld [vmem:[%s1502_s1 + $0x38] sm:$0xff]  ;;  %v888_v53 = vmov 1326507024  }
   0x4   :  { %47 = vmatpush.msra.mxu0 %v44_v1  ;;  %846 = vmatpush.msra.mxu3 %v44_v1  ;;  %v36_v9 = vld [vmem:[%s1502_s1 + $0x30] sm:$0xff]  ;;  %v35_v10 = vld [vmem:[%s1502_s1 + $0x28] sm:$0xff]  ;;  %v34_v11 = vld [vmem:[%s1502_s1 + $0x20] sm:$0xff] }
   0x5   :  { %v33_v12 = vld [vmem:[%s1502_s1 + $0x18] sm:$0xff]  ;;  %v32_v13 = vld [vmem:[%s1502_s1 + $0x10] sm:$0xff]  ;;  %v31_v14 = vld [vmem:[%s1502_s1 + $0x8] sm:$0xff] }
   0x6   :  { %48 = vmatpush.msra.mxu0 %v43_v2  ;;  %847 = vmatpush.msra.mxu3 %v43_v2  ;;  %v30_v15 = vld [vmem:[%s1502_s1] sm:$0xff]  ;;  %v29_v17 = vld [vmem:[%s1503_s0 + $0x8] sm:$0xff] }
   0x7   :  { %v28_v16 = vld [vmem:[%s1503_s0] sm:$0xff] }
   0x8   :  { %49 = vmatpush.msra.mxu0 %v42_v3  ;;  %848 = vmatpush.msra.mxu3 %v42_v3 }
   0xa   :  { %50 = vmatpush.msra.mxu0 %v41_v4  ;;  %849 = vmatpush.msra.mxu3 %v41_v4 }
   0xc   :  { %51 = vmatpush.msra.mxu0 %v40_v5  ;;  %850 = vmatpush.msra.mxu3 %v40_v5 }
   0xe   :  { %52 = vmatpush.msra.mxu0 %v39_v6  ;;  %851 = vmatpush.msra.mxu3 %v39_v6 }
  0x10   :  { %53 = vmatpush.msra.mxu0 %v38_v7  ;;  %852 = vmatpush.msra.mxu3 %v38_v7 }
  0x12   :  { %54 = vmatpush.msra.mxu0 %v37_v8  ;;  %853 = vmatpush.msra.mxu3 %v37_v8 }
  0x14   :  { %55 = vmatpush.msra.mxu0 %v36_v9  ;;  %854 = vmatpush.msra.mxu3 %v36_v9 }
  0x16   :  { %56 = vmatpush.msra.mxu0 %v35_v10  ;;  %855 = vmatpush.msra.mxu3 %v35_v10 }
  0x18   :  { %57 = vmatpush.msra.mxu0 %v34_v11  ;;  %856 = vmatpush.msra.mxu3 %v34_v11 }
  0x1a   :  { %58 = vmatpush.msra.mxu0 %v33_v12  ;;  %857 = vmatpush.msra.mxu3 %v33_v12 }
  0x1c   :  { %59 = vmatpush.msra.mxu0 %v32_v13  ;;  %858 = vmatpush.msra.mxu3 %v32_v13 }
  0x1e   :  { %60 = vmatpush.msra.mxu0 %v31_v14  ;;  %859 = vmatpush.msra.mxu3 %v31_v14 }
  0x20   :  { %61 = vmatpush.msra.mxu0 %v30_v15  ;;  %860 = vmatpush.msra.mxu3 %v30_v15 }
  0x21   :  { %62 = vmatmul.f32.vlgmr.msra.gmra.mxu0 %v28_v16  ;;  %65 = vmatmul.f32.vlgmr.msra.gmra.mxu3 %v29_v17 }
  0x9e   :  { %v984_v18 = vpop.f32.mrf.mxu0 }
  0x9f   :  { %v69_v19 = vand.u32 2147483647, %v984_v18  ;;  %v72_v20 = vand.u32 2139095040, %v984_v18  ;;  %871 = vtanh.f32 %v984_v18 }
  0xa1   :  { %v73_v21 = vshrl.u32 %v72_v20, 23  ;;  %v76_v22 = vand.u32 8388607, %v69_v19 }
  0xa3   :  { %v833_v23 = vadd.s32 4294967169, %v73_v21  ;;  %v77_v24 = vor.u32 8388608, %v76_v22 }
  0xa4   :  { %v990_v25 = vpop.f32.mrf.mxu3 }
  0xa5   :  { %v79_v26 = vadd.s32 1, %v833_v23  ;;  %v224_v27 = vand.u32 2147483647, %v990_v25  ;;  %v227_v28 = vand.u32 2139095040, %v990_v25  ;;  %v994_v29 = vshll.u32 %v77_v24, 8 }
  0xa6   :  { %873 = vtanh.f32 %v990_v25 }
  0xa7   :  { %vm80_vm0 = vcmp.gt.s32.totalorder %v79_v26, 0  ;;  %v228_v31 = vshrl.u32 %v227_v28, 23  ;;  %v231_v32 = vand.u32 8388607, %v224_v27  ;;  %v118_v36 = vand.u32 65535, %v994_v29 }
  0xa8   :  { %v81_v30 = vsel %vm80_vm0, %v79_v26, 0  ;;  %v119_v9 = vshrl.u32 %v994_v29, 16 }
  0xa9   :  { %v83_v33 = vand.u32 31, %v81_v30  ;;  %v82_v34 = vshrl.u32 %v81_v30, 5  ;;  %v836_v37 = vadd.s32 4294967169, %v228_v31  ;;  %v232_v44 = vor.u32 8388608, %v231_v32 }
  0xab   :  { %v84_v35 = vsub.s32 32, %v83_v33  ;;  %v86_v39 = vshll.u32 %v883_v38, %v83_v33  ;;  %v89_v41 = vshll.u32 %v884_v40, %v83_v33  ;;  %v92_v43 = vshll.u32 %v885_v42, %v83_v33 }
  0xac   :  { %v95_v49 = vshll.u32 %v886_v47, %v83_v33  ;;  %v98_v52 = vshll.u32 %v887_v50, %v83_v33  ;;  %vm101_vm1 = vcmp.lt.s32.totalorder %v82_v34, 1  ;;  %v234_v58 = vadd.s32 1, %v836_v37 }
  0xad   :  { %v87_v45 = vshrl.u32 %v884_v40, %v84_v35  ;;  %v90_v46 = vshrl.u32 %v885_v42, %v84_v35  ;;  %v93_v48 = vshrl.u32 %v886_v47, %v84_v35  ;;  %v96_v51 = vshrl.u32 %v887_v50, %v84_v35 }
  0xae   :  { %v99_v54 = vshrl.u32 %v888_v53, %v84_v35  ;;  %vm102_vm2 = vcmp.lt.s32.totalorder %v82_v34, 2  ;;  %vm104_vm3 = vcmp.lt.s32.totalorder %v82_v34, 4  ;;  %v85_v61 = vshrl.u32 %v883_v38, %v84_v35 }
  0xaf   :  { %v88_v55 = vor.u32 %v87_v45, %v86_v39  ;;  %v91_v56 = vor.u32 %v90_v46, %v89_v41  ;;  %v94_v57 = vor.u32 %v93_v48, %v92_v43  ;;  %v97_v59 = vor.u32 %v96_v51, %v95_v49 }
  0xb0   :  { %v100_v60 = vor.u32 %v99_v54, %v98_v52  ;;  %vm103_vm4 = vcmp.lt.s32.totalorder %v82_v34, 3  ;;  %vm235_vm5 = vcmp.gt.s32.totalorder %v234_v58, 0  ;;  %v1019_v16 = vshll.u32 %v232_v44, 8 }
  0xb1   :  { %v106_v62 = vsel %vm104_vm3, %v94_v57, 2102212464  ;;  %v109_v63 = vsel %vm101_vm1, %v88_v55, %v91_v56  ;;  %v113_v0 = vsel %vm101_vm1, %v91_v56, %v94_v57  ;;  %v110_v1 = vsel %vm104_vm3, %v97_v59, 920167782 }
  0xb2   :  { %v114_v2 = vsel %vm104_vm3, %v100_v60, 1326507024  ;;  %v105_v3 = vsel %vm101_vm1, %v85_v61, %v88_v55  ;;  %v107_v4 = vsel %vm103_vm4, %v91_v56, %v106_v62  ;;  %v111_v5 = vsel %vm103_vm4, %v94_v57, %v110_v1 }
  0xb3   :  { %v115_v6 = vsel %vm103_vm4, %v97_v59, %v114_v2  ;;  %v112_v7 = vsel %vm102_vm2, %v109_v63, %v111_v5  ;;  %v236_v10 = vsel %vm235_vm5, %v234_v58, 0  ;;  %v1017_v15 = vsel %vm102_vm2, %v105_v3, %v107_v4 }
  0xb4   :  { %v116_v8 = vsel %vm102_vm2, %v113_v0, %v115_v6  ;;  %v142_v13 = vand.u32 65535, %v112_v7  ;;  %v143_v14 = vshrl.u32 %v112_v7, 16  ;;  %v1021_v21 = vshrl.u32 %v236_v10, 5 }
  0xb5   :  { %v120_v11 = vand.u32 65535, %v116_v8  ;;  %v121_v12 = vshrl.u32 %v116_v8, 16  ;;  %v238_v22 = vand.u32 31, %v236_v10  ;;  %v889_v45 = vmov 0  }
  0xb6   :  { %v145_v26 = vmul.u32 %v143_v14, %v118_v36  ;;  %v146_v28 = vmul.u32 %v142_v13, %v119_v9  ;;  %v144_v32 = vmul.u32 %v142_v13, %v118_v36  ;;  %v147_v33 = vmul.u32 %v143_v14, %v119_v9 }
  0xb7   :  { %v123_v17 = vmul.u32 %v121_v12, %v118_v36  ;;  %v124_v20 = vmul.u32 %v120_v11, %v119_v9  ;;  %v122_v23 = vmul.u32 %v120_v11, %v118_v36  ;;  %v125_v24 = vmul.u32 %v121_v12, %v119_v9 }
  0xb8   :  { %v148_v34 = vshll.u32 %v145_v26, 16  ;;  %v149_v39 = vshrl.u32 %v145_v26, 16  ;;  %v150_v43 = vshll.u32 %v146_v28, 16  ;;  %v1023_v44 = vsub.s32 32, %v238_v22 }
  0xb9   :  { %v126_v30 = vshll.u32 %v123_v17, 16  ;;  %v127_v31 = vshrl.u32 %v123_v17, 16  ;;  %v128_v35 = vshll.u32 %v124_v20, 16  ;;  %v129_v37 = vshrl.u32 %v124_v20, 16 }
  0xba   :  { %vm152_vm7 = vc.u32 %v144_v32, %v148_v34  ;;  %v154_v48 = vadd.s32 %v148_v34, %v144_v32  ;;  %v241_v49 = vshll.u32 %v883_v38, %v238_v22  ;;  %v244_v52 = vshll.u32 %v884_v40, %v238_v22 }
  0xbb   :  { %vm130_vm6 = vc.u32 %v122_v23, %v126_v30  ;;  %v132_v41 = vadd.s32 %v126_v30, %v122_v23  ;;  %v153_v36 = vsel %vm152_vm7, 1, %v889_v45  ;;  %v151_v55 = vshrl.u32 %v146_v28, 16 }
  0xbc   :  { %v131_v46 = vsel %vm130_vm6, 1, %v889_v45  ;;  %v155_v56 = vadd.s32 %v153_v36, %v147_v33  ;;  %vm156_vm9 = vc.u32 %v154_v48, %v150_v43  ;;  %v242_v59 = vshrl.u32 %v884_v40, %v1023_v44 }
  0xbd   :  { %v133_v51 = vadd.s32 %v131_v46, %v125_v24  ;;  %vm134_vm8 = vc.u32 %v132_v41, %v128_v35  ;;  %v157_v58 = vsel %vm156_vm9, 1, %v889_v45  ;;  %v245_v60 = vshrl.u32 %v885_v42, %v1023_v44 }
  0xbe   :  { %v135_v54 = vsel %vm134_vm8, 1, %v889_v45  ;;  %v159_v61 = vadd.s32 %v157_v58, %v155_v56  ;;  %v247_v62 = vshll.u32 %v885_v42, %v238_v22  ;;  %v248_v63 = vshrl.u32 %v886_v47, %v1023_v44 }
  0xbf   :  { %v137_v57 = vadd.s32 %v135_v54, %v133_v51  ;;  %v250_v0 = vshll.u32 %v886_v47, %v238_v22  ;;  %v1039_v2 = vor.u32 %v242_v59, %v241_v49  ;;  %v1041_v3 = vor.u32 %v245_v60, %v244_v52 }
  0xc0   :  { %v251_v4 = vshrl.u32 %v887_v50, %v1023_v44  ;;  %v160_v5 = vadd.s32 %v159_v61, %v149_v39  ;;  %v249_v6 = vor.u32 %v248_v63, %v247_v62  ;;  %v253_v7 = vshll.u32 %v887_v50, %v238_v22 }
  0xc1   :  { %v138_v1 = vadd.s32 %v137_v57, %v127_v31  ;;  %v254_v8 = vshrl.u32 %v888_v53, %v1023_v44  ;;  %v1050_v10 = vadd.s32 %v154_v48, %v150_v43  ;;  %vm256_vm10 = vcmp.lt.s32.totalorder %v1021_v21, 1 }
  0xc2   :  { %v252_v11 = vor.u32 %v251_v4, %v250_v0  ;;  %v161_v12 = vadd.s32 %v160_v5, %v151_v55  ;;  %vm259_vm11 = vcmp.lt.s32.totalorder %v1021_v21, 4  ;;  %v264_v14 = vsel %vm256_vm10, %v1039_v2, %v1041_v3 }
  0xc3   :  { %v1048_v9 = vadd.s32 %v138_v1, %v129_v37  ;;  %v255_v13 = vor.u32 %v254_v8, %v253_v7  ;;  %vm258_vm13 = vcmp.lt.s32.totalorder %v1021_v21, 3  ;;  %vm257_vm14 = vcmp.lt.s32.totalorder %v1021_v21, 2 }
  0xc4   :  { %v265_v17 = vsel %vm259_vm11, %v252_v11, 920167782  ;;  %v165_v20 = vadd.s32 1, %v161_v12  ;;  %v268_v23 = vsel %vm256_vm10, %v1041_v3, %v249_v6  ;;  %v162_v24 = vmul.u32 %v994_v29, %v1017_v15 }
  0xc5   :  { %vm164_vm12 = vc.u32 %v1048_v9, %v1050_v10  ;;  %v266_v22 = vsel %vm258_vm13, %v249_v6, %v265_v17  ;;  %v269_v28 = vsel %vm259_vm11, %v255_v13, 1326507024  ;;  %v273_v30 = vand.u32 65535, %v1019_v16 }
  0xc6   :  { %v267_v26 = vsel %vm257_vm14, %v264_v14, %v266_v22  ;;  %v166_v31 = vsel %vm164_vm12, %v165_v20, %v161_v12  ;;  %v270_v32 = vsel %vm258_vm13, %v252_v11, %v269_v28  ;;  %v274_v29 = vshrl.u32 %v1019_v16, 16 }
  0xc7   :  { %v297_v33 = vand.u32 65535, %v267_v26  ;;  %v298_v35 = vshrl.u32 %v267_v26, 16  ;;  %v167_v37 = vadd.s32 %v166_v31, %v162_v24  ;;  %v271_v34 = vsel %vm257_vm14, %v268_v23, %v270_v32 }
  0xc8   :  { %v275_v15 = vand.u32 65535, %v271_v34  ;;  %v276_v39 = vshrl.u32 %v271_v34, 16  ;;  %v240_v1 = vshrl.u32 %v883_v38, %v1023_v44  ;;  %v261_v11 = vsel %vm259_vm11, %v249_v6, 2102212464 }
  0xc9   :  { %v300_v41 = vmul.u32 %v298_v35, %v273_v30  ;;  %v168_v43 = vadd.s32 536870912, %v167_v37  ;;  %v301_v46 = vmul.u32 %v297_v33, %v274_v29  ;;  %v299_v36 = vmul.u32 %v297_v33, %v273_v30 }
  0xca   :  { %v278_v48 = vmul.u32 %v276_v39, %v273_v30  ;;  %v279_v49 = vmul.u32 %v275_v15, %v274_v29  ;;  %v277_v54 = vmul.u32 %v275_v15, %v273_v30  ;;  %v280_v55 = vmul.u32 %v276_v39, %v274_v29 }
  0xcb   :  { %v1081_v51 = vshrl.u32 %v168_v43, 30  ;;  %v303_v52 = vshll.u32 %v300_v41, 16  ;;  %v302_v57 = vmul.u32 %v298_v35, %v274_v29  ;;  %v305_v60 = vshll.u32 %v301_v46, 16 }
  0xcc   :  { %v281_v56 = vshll.u32 %v278_v48, 16  ;;  %v283_v59 = vshll.u32 %v279_v49, 16  ;;  %v282_v13 = vshrl.u32 %v278_v48, 16  ;;  %v260_v44 = vsel %vm256_vm10, %v240_v1, %v1039_v2  ;;  %v410_v1 = vld [vmem:[%s1505_s3 + $0x48] sm:$0xff] }
  0xcd   :  { %v170_v58 = vshll.u32 %v1081_v51, 30  ;;  %vm307_vm15 = vc.u32 %v299_v36, %v303_v52  ;;  %v309_v63 = vadd.s32 %v303_v52, %v299_v36  ;;  %v304_v22 = vshrl.u32 %v300_v41, 16 }
  0xce   :  { %vm285_vm0 = vc.u32 %v277_v54, %v281_v56  ;;  %v287_v61 = vadd.s32 %v281_v56, %v277_v54  ;;  %v308_v62 = vsel %vm307_vm15, 1, %v889_v45  ;;  %v262_v26 = vsel %vm258_vm13, %v1041_v3, %v261_v11  ;;  %v416_v3 = vld [vmem:[%s1505_s3 + $0x78] sm:$0xff]  ;;  %v414_v54 = vld [vmem:[%s1505_s3 + $0x68] sm:$0xff] }
  0xcf   :  { %v171_v0 = vsub.s32 %v167_v37, %v170_v58  ;;  %v286_v4 = vsel %vm285_vm0, 1, %v889_v45  ;;  %v310_v5 = vadd.s32 %v308_v62, %v302_v57  ;;  %vm311_vm2 = vc.u32 %v309_v63, %v305_v60  ;;  %417 = vmatpush.msra.mxu1 %v416_v3  ;;  %v412_v58 = vld [vmem:[%s1505_s3 + $0x58] sm:$0xff]  ;;  %v411_v62 = vld [vmem:[%s1505_s3 + $0x50] sm:$0xff] }
  0xd0   :  { %v288_v7 = vadd.s32 %v286_v4, %v280_v55  ;;  %vm289_vm1 = vc.u32 %v287_v61, %v283_v59  ;;  %v312_v17 = vsel %vm311_vm2, 1, %v889_v45  ;;  %v284_v28 = vshrl.u32 %v279_v49, 16 }
  0xd1   :  { %vm172_vm3 = vcmp.lt.s32.totalorder %v171_v0, 0  ;;  %v173_v8 = vsub.s32 0, %v171_v0  ;;  %v290_v12 = vsel %vm289_vm1, 1, %v889_v45  ;;  %v314_v23 = vadd.s32 %v312_v17, %v310_v5 }
  0xd2   :  { %v292_v14 = vadd.s32 %v290_v12, %v288_v7  ;;  %v306_v30 = vshrl.u32 %v301_v46, 16  ;;  %v1100_v35 = vadd.s32 %v309_v63, %v305_v60  ;;  %v263_v37 = vsel %vm257_vm14, %v260_v44, %v262_v26  ;;  %v415_v46 = vld [vmem:[%s1505_s3 + $0x70] sm:$0xff]  ;;  %v409_v7 = vld [vmem:[%s1505_s3 + $0x40] sm:$0xff] }
  0xd3   :  { %v174_v20 = vsel %vm172_vm3, %v173_v8, %v171_v0  ;;  %v315_v31 = vadd.s32 %v314_v23, %v304_v22  ;;  %v163_v15 = vadd.s32 %v1050_v10, %v1048_v9  ;;  %v317_v43 = vmul.u32 %v1019_v16, %v263_v37  ;;  %418 = vmatpush.msra.mxu1 %v415_v46  ;;  %v413_v16 = vld [vmem:[%s1505_s3 + $0x60] sm:$0xff]  ;;  %v407_v22 = vld [vmem:[%s1505_s3 + $0x30] sm:$0xff] }
  0xd4   :  { %v175_v24 = vclz %v174_v20  ;;  %v293_v6 = vadd.s32 %v292_v14, %v282_v13  ;;  %vm71_vm7 = vcmp.lt.s32.totalorder %v984_v18, 0  ;;  %vm1139_vm8 = vcmp.le.f32.partialorder %v69_v19, 0.7853982  ;;  %v408_v20 = vld [vmem:[%s1505_s3 + $0x38] sm:$0xff] }
  0xd5   :  { %v316_v2 = vadd.s32 %v315_v31, %v306_v30  ;;  %419 = vmatpush.msra.mxu1 %v414_v54  ;;  %v193_v13 = vsub.s32 4, %v1081_v51  ;;  %vm226_vm12 = vcmp.lt.s32.totalorder %v990_v25, 0  ;;  %vm1189_vm1 = vcmp.le.f32.partialorder %v224_v27, 0.7853982 }
  0xd6   :  { %v834_v32 = vadd.s32 4294967294, %v175_v24  ;;  %v1098_v33 = vadd.s32 %v293_v6, %v284_v28  ;;  %v406_v28 = vld [vmem:[%s1505_s3 + $0x28] sm:$0xff]  ;;  %v405_v6 = vld [vmem:[%s1505_s3 + $0x20] sm:$0xff]  ;;  %vm212_vm2 = vweird.f32 %v984_v18 }
  0xd7   :  { %v320_v29 = vadd.s32 1, %v316_v2  ;;  %420 = vmatpush.msra.mxu1 %v413_v16  ;;  %v194_v26 = vsel %vm71_vm7, %v193_v13, %v1081_v51  ;;  %v404_v51 = vld [vmem:[%s1505_s3 + $0x18] sm:$0xff] }
  0xd8   :  { %vm835_vm4 = vcmp.lt.s32.totalorder %v834_v32, 0  ;;  %vm319_vm5 = vc.u32 %v1098_v33, %v1100_v35 }
  0xd9   :  { %v178_v34 = vsel %vm835_vm4, 0, %v834_v32  ;;  %v321_v21 = vsel %vm319_vm5, %v320_v29, %v316_v2  ;;  %421 = vmatpush.msra.mxu1 %v412_v58  ;;  %v318_v32 = vadd.s32 %v1100_v35, %v1098_v33  ;;  %v26_v35 = vlaneseq }
  0xda   :  { %v179_v39 = vsub.s32 32, %v178_v34  ;;  %v183_v41 = vsub.s32 4294967266, %v178_v34  ;;  %v180_v48 = vshll.u32 %v171_v0, %v178_v34  ;;  %v322_v52 = vadd.s32 %v321_v21, %v317_v43  ;;  %v403_v43 = vld [vmem:[%s1505_s3 + $0x10] sm:$0xff] }
  0xdb   :  { %422 = vmatpush.msra.mxu1 %v411_v62  ;;  %v196_v34 = vsel %vm1139_vm8, 0, %v194_v26  ;;  %v1180_v16 = vand.u32 127, %v26_v35 }
  0xdc   :  { %v181_v49 = vshrl.u32 %v163_v15, %v179_v39  ;;  %v184_v36 = vadd.s32 127, %v183_v41  ;;  %v323_v55 = vadd.s32 536870912, %v322_v52  ;;  %v213_v46 = vadd.s32 3, %v196_v34 }
  0xdd   :  { %423 = vmatpush.msra.mxu1 %v410_v1  ;;  %vm388_vm10 = vcmp.ge.s32.totalorder %v1180_v16, 32  ;;  %vm389_vm11 = vcmp.lt.s32.totalorder %v1180_v16, 64  ;;  %vm380_vm0 = vcmp.lt.s32.totalorder %v1180_v16, 32 }
  0xde   :  { %v182_v9 = vor.u32 %v181_v49, %v180_v48  ;;  %v185_v10 = vshll.u32 %v184_v36, 23  ;;  %v1121_v57 = vshrl.u32 %v323_v55, 30  ;;  %v402_v36 = vld [vmem:[%s1505_s3 + $0x8] sm:$0xff]  ;;  %vm1198_vm3 = vmand %vm388_vm10, %vm389_vm11 }
  0xdf   :  { %424 = vmatpush.msra.mxu1 %v409_v7 }
  0xe0   :  { %v186_v56 = vor.u32 4788187, %v185_v10  ;;  %v189_v60 = vcvt.s32.f32 %v182_v9  ;;  %v325_v61 = vshll.u32 %v1121_v57, 30  ;;  %v401_v10 = vld [vmem:[%s1505_s3] sm:$0xff]  ;;  %v348_v27 = vsub.s32 4, %v1121_v57 }
  0xe1   :  { %425 = vmatpush.msra.mxu1 %v408_v20 }
  0xe2   :  { %v187_v59 = vand.u32 2147483647, %v186_v56  ;;  %v326_v0 = vsub.s32 %v322_v52, %v325_v61 }
  0xe3   :  { %426 = vmatpush.msra.mxu1 %v407_v22 }
  0xe4   :  { %v190_v63 = vmul.f32 %v189_v60, %v187_v59  ;;  %vm327_vm6 = vcmp.lt.s32.totalorder %v326_v0, 0  ;;  %v328_v5 = vsub.s32 0, %v326_v0  ;;  %v214_v60 = vand.u32 3, %v213_v46 }
  0xe5   :  { %427 = vmatpush.msra.mxu1 %v406_v28 }
  0xe6   :  { %v191_v4 = vxor.u32 2147483648, %v190_v63  ;;  %v329_v12 = vsel %vm327_vm6, %v328_v5, %v326_v0  ;;  %vm216_vm13 = vcmp.eq.s32.totalorder %v214_v60, 0  ;;  %vm219_vm14 = vcmp.eq.s32.totalorder %v214_v60, 2 }
  0xe7   :  { %v330_v17 = vclz %v329_v12  ;;  %428 = vmatpush.msra.mxu1 %v405_v6  ;;  %vm215_vm15 = vcmp.lt.s32.totalorder %v214_v60, 2  ;;  %v349_v6 = vsel %vm226_vm12, %v348_v27, %v1121_v57 }
  0xe8   :  { %v192_v11 = vsel %vm71_vm7, %v191_v4, %v190_v63  ;;  %vm367_vm7 = vweird.f32 %v990_v25 }
  0xe9   :  { %v195_v14 = vsel %vm1139_vm8, %v984_v18, %v192_v11  ;;  %v837_v44 = vadd.s32 4294967294, %v330_v17  ;;  %429 = vmatpush.msra.mxu1 %v404_v51 }
  0xea   :  { %v197_v19 = vmul.f32 %v195_v14, %v195_v14 }
  0xeb   :  { %vm838_vm9 = vcmp.lt.s32.totalorder %v837_v44, 0  ;;  %430 = vmatpush.msra.mxu1 %v403_v43 }
  0xec   :  { %v205_v23 = vmul.f32 -0.00019511016, %v197_v19  ;;  %v198_v24 = vmul.f32 -0.001358992, %v197_v19  ;;  %v333_v31 = vsel %vm838_vm9, 0, %v837_v44 }
  0xed   :  { %v334_v37 = vsub.s32 32, %v333_v31  ;;  %v338_v2 = vsub.s32 4294967266, %v333_v31  ;;  %v335_v15 = vshll.u32 %v326_v0, %v333_v31  ;;  %431 = vmatpush.msra.mxu1 %v402_v36 }
  0xee   :  { %v206_v30 = vadd.f32 0.008332121, %v205_v23  ;;  %v199_v3 = vadd.f32 0.041655596, %v198_v24 }
  0xef   :  { %v336_v39 = vshrl.u32 %v318_v32, %v334_v37  ;;  %v339_v41 = vadd.s32 127, %v338_v2  ;;  %432 = vmatpush.msra.mxu1 %v401_v10  ;;  %v351_v32 = vsel %vm1189_vm1, 0, %v349_v6 }
  0xf0   :  { %v207_v29 = vmul.f32 %v206_v30, %v197_v19  ;;  %v200_v21 = vmul.f32 %v199_v3, %v197_v19  ;;  %v368_v34 = vadd.s32 3, %v351_v32 }
  0xf1   :  { %v337_v48 = vor.u32 %v336_v39, %v335_v15  ;;  %v340_v49 = vshll.u32 %v339_v41, 23 }
  0xf2   :  { %v208_v33 = vadd.f32 -0.16666654, %v207_v29  ;;  %v201_v54 = vadd.f32 -0.4999988, %v200_v21  ;;  %v369_v41 = vand.u32 3, %v368_v34 }
  0xf3   :  { %v341_v9 = vor.u32 4788187, %v340_v49  ;;  %v344_v59 = vcvt.s32.f32 %v337_v48 }
  0xf4   :  { %v209_v52 = vmul.f32 %v208_v33, %v197_v19  ;;  %v202_v56 = vmul.f32 %v201_v54, %v197_v19  ;;  %v872_v19 = vpop.eup %871  ;;  %vm371_vm4 = vcmp.eq.s32.totalorder %v369_v41, 0  ;;  %vm374_vm5 = vcmp.eq.s32.totalorder %v369_v41, 2 }
  0xf5   :  { %v342_v58 = vand.u32 2147483647, %v341_v9  ;;  %vm370_vm6 = vcmp.lt.s32.totalorder %v369_v41, 2  ;;  %v874_v49 = vpop.eup %873 }
  0xf6   :  { %v210_v55 = vadd.f32 1.0, %v209_v52  ;;  %v203_v62 = vadd.f32 1.0, %v202_v56 }
  0xf7   :  { %v345_v63 = vmul.f32 %v344_v59, %v342_v58 }
  0xf8   :  { %v211_v61 = vmul.f32 %v210_v55, %v195_v14  ;;  %v220_v1 = vxor.u32 2147483648, %v203_v62  ;;  %v868_v14 = vld [vmem:[%s1504_s2] ss:$0 sm:$0xff] }
  0xf9   :  { %v346_v4 = vxor.u32 2147483648, %v345_v63 }
  0xfa   :  { %v217_v0 = vxor.u32 2147483648, %v211_v61  ;;  %v221_v7 = vsel %vm219_vm14, %v220_v1, %v211_v61 }
  0xfb   :  { %v347_v11 = vsel %vm226_vm12, %v346_v4, %v345_v63 }
  0xfc   :  { %v218_v5 = vsel %vm216_vm13, %v203_v62, %v217_v0  ;;  %v350_v17 = vsel %vm1189_vm1, %v990_v25, %v347_v11 }
  0xfd   :  { %v222_v12 = vsel %vm215_vm15, %v218_v5, %v221_v7  ;;  %v352_v44 = vmul.f32 %v350_v17, %v350_v17 }
  0xfe   :  { %v223_v20 = vsel %vm212_vm2, nan, %v222_v12 }
  0xff   :  { %v384_v22 = vsel %vm380_vm0, %v223_v20, %v984_v18  ;;  %v360_v24 = vmul.f32 -0.00019511016, %v352_v44  ;;  %v353_v28 = vmul.f32 -0.001358992, %v352_v44 }
 0x100   :  { %v393_v23 = vsel %vm1198_vm3, %v872_v19, %v384_v22 }
 0x101   :  { %v399_v26 = vmul.f32 %v868_v14, %v393_v23  ;;  %v361_v30 = vadd.f32 0.008332121, %v360_v24  ;;  %v354_v31 = vadd.f32 0.041655596, %v353_v28 }
 0x103   :  { %433 = vmatmul.f32.vlgmr.msra.gmra.mxu1 %v399_v26  ;;  %v362_v37 = vmul.f32 %v361_v30, %v352_v44  ;;  %v355_v2 = vmul.f32 %v354_v31, %v352_v44 }
 0x105   :  { %v363_v51 = vadd.f32 -0.16666654, %v362_v37  ;;  %v356_v18 = vadd.f32 -0.4999988, %v355_v2 }
 0x107   :  { %v364_v29 = vmul.f32 %v363_v51, %v352_v44  ;;  %v357_v3 = vmul.f32 %v356_v18, %v352_v44 }
 0x109   :  { %v365_v15 = vadd.f32 1.0, %v364_v29  ;;  %v358_v39 = vadd.f32 1.0, %v357_v3 }
 0x10b   :  { %v366_v43 = vmul.f32 %v365_v15, %v350_v17  ;;  %v375_v33 = vxor.u32 2147483648, %v358_v39 }
 0x10d   :  { %v372_v57 = vxor.u32 2147483648, %v366_v43  ;;  %v376_v21 = vsel %vm374_vm5, %v375_v33, %v366_v43 }
 0x10f   :  { %v373_v35 = vsel %vm371_vm4, %v358_v39, %v372_v57 }
 0x110   :  { %v377_v46 = vsel %vm370_vm6, %v373_v35, %v376_v21 }
 0x111   :  { %v378_v48 = vsel %vm367_vm7, nan, %v377_v46 }
 0x112   :  { %v385_v36 = vsel %vm380_vm0, %v378_v48, %v990_v25 }
 0x113   :  { %v394_v52 = vsel %vm1198_vm3, %v874_v49, %v385_v36 }
 0x114   :  { %v400_v54 = vmul.f32 %v868_v14, %v394_v52 }
 0x116   :  { %436 = vmatmul.f32.gmra.mxu1 %v400_v54 }
 0x180   :  { %v1226_v9 = vpop.f32.mrf.mxu1 }
 0x181   :  { %v443_v10 = vand.u32 2139095040, %v1226_v9  ;;  %v1230_v58 = vand.u32 2147483647, %v1226_v9 }
 0x183   :  { %v444_v55 = vshrl.u32 %v443_v10, 23  ;;  %v447_v60 = vand.u32 8388607, %v1230_v58  ;;  %875 = vlog2.f32 %v1230_v58 }
 0x185   :  { %v839_v56 = vadd.s32 4294967169, %v444_v55  ;;  %v448_v0 = vor.u32 8388608, %v447_v60 }
 0x187   :  { %v450_v59 = vadd.s32 1, %v839_v56  ;;  %v1252_v26 = vshll.u32 %v448_v0, 8 }
 0x189   :  { %vm451_vm8 = vcmp.gt.s32.totalorder %v450_v59, 0  ;;  %v489_v34 = vand.u32 65535, %v1252_v26  ;;  %v490_v21 = vshrl.u32 %v1252_v26, 16 }
 0x18a   :  { %v452_v61 = vsel %vm451_vm8, %v450_v59, 0 }
 0x18b   :  { %v454_v25 = vand.u32 31, %v452_v61  ;;  %v1233_v62 = vshrl.u32 %v452_v61, 5 }
 0x18d   :  { %v455_v63 = vsub.s32 32, %v454_v25  ;;  %v457_v1 = vshll.u32 %v883_v38, %v454_v25  ;;  %v460_v4 = vshll.u32 %v884_v40, %v454_v25  ;;  %v463_v5 = vshll.u32 %v885_v42, %v454_v25 }
 0x18e   :  { %v466_v7 = vshll.u32 %v886_v47, %v454_v25  ;;  %v469_v14 = vshll.u32 %v887_v50, %v454_v25  ;;  %vm472_vm9 = vcmp.lt.s32.totalorder %v1233_v62, 1  ;;  %vm475_vm11 = vcmp.lt.s32.totalorder %v1233_v62, 4 }
 0x18f   :  { %v458_v8 = vshrl.u32 %v884_v40, %v455_v63  ;;  %v461_v11 = vshrl.u32 %v885_v42, %v455_v63  ;;  %v464_v12 = vshrl.u32 %v886_v47, %v455_v63  ;;  %v467_v13 = vshrl.u32 %v887_v50, %v455_v63 }
 0x190   :  { %v470_v27 = vshrl.u32 %v888_v53, %v455_v63  ;;  %vm474_vm12 = vcmp.lt.s32.totalorder %v1233_v62, 3  ;;  %vm473_vm13 = vcmp.lt.s32.totalorder %v1233_v62, 2  ;;  %v456_v52 = vshrl.u32 %v883_v38, %v455_v63 }
 0x191   :  { %v459_v17 = vor.u32 %v458_v8, %v457_v1  ;;  %v462_v20 = vor.u32 %v461_v11, %v460_v4  ;;  %v465_v19 = vor.u32 %v464_v12, %v463_v5  ;;  %v468_v44 = vor.u32 %v467_v13, %v466_v7 }
 0x192   :  { %v471_v22 = vor.u32 %v470_v27, %v469_v14 }
 0x193   :  { %v480_v23 = vsel %vm472_vm9, %v459_v17, %v462_v20  ;;  %v481_v24 = vsel %vm475_vm11, %v468_v44, 920167782  ;;  %v484_v6 = vsel %vm472_vm9, %v462_v20, %v465_v19  ;;  %v1263_v32 = vpop.f32.mrf.mxu1  ;;  %v477_v46 = vsel %vm475_vm11, %v465_v19, 2102212464 }
 0x194   :  { %v482_v28 = vsel %vm474_vm12, %v465_v19, %v481_v24  ;;  %v485_v30 = vsel %vm475_vm11, %v471_v22, 1326507024  ;;  %v1268_v2 = vand.u32 2147483647, %v1263_v32  ;;  %v598_v51 = vand.u32 2139095040, %v1263_v32 }
 0x195   :  { %v486_v31 = vsel %vm474_vm12, %v468_v44, %v485_v30  ;;  %v483_v37 = vsel %vm473_vm13, %v480_v23, %v482_v28  ;;  %v476_v61 = vsel %vm472_vm9, %v456_v52, %v459_v17  ;;  %v478_v25 = vsel %vm474_vm12, %v462_v20, %v477_v46 }
 0x196   :  { %v487_v18 = vsel %vm473_vm13, %v484_v6, %v486_v31  ;;  %v514_v29 = vshrl.u32 %v483_v37, 16  ;;  %v599_v3 = vshrl.u32 %v598_v51, 23  ;;  %v602_v15 = vand.u32 8388607, %v1268_v2 }
 0x197   :  { %v513_v39 = vand.u32 65535, %v483_v37  ;;  %v491_v41 = vand.u32 65535, %v487_v18  ;;  %v492_v43 = vshrl.u32 %v487_v18, 16  ;;  %877 = vlog2.f32 %v1268_v2 }
 0x198   :  { %v1275_v33 = vmul.u32 %v514_v29, %v489_v34  ;;  %v842_v57 = vadd.s32 4294967169, %v599_v3  ;;  %v603_v35 = vor.u32 8388608, %v602_v15  ;;  %v518_v7 = vmul.u32 %v514_v29, %v490_v21 }
 0x199   :  { %v1280_v48 = vmul.u32 %v492_v43, %v489_v34  ;;  %v515_v54 = vmul.u32 %v513_v39, %v489_v34  ;;  %v1284_v10 = vmul.u32 %v513_v39, %v490_v21  ;;  %v493_v56 = vmul.u32 %v491_v41, %v489_v34 }
 0x19a   :  { %v519_v49 = vshll.u32 %v1275_v33, 16  ;;  %v605_v36 = vadd.s32 1, %v842_v57  ;;  %v1286_v55 = vshll.u32 %v603_v35, 8  ;;  %v1288_v59 = vmul.u32 %v491_v41, %v490_v21 }
 0x19b   :  { %v497_v60 = vshll.u32 %v1280_v48, 16  ;;  %v496_v4 = vmul.u32 %v492_v43, %v490_v21  ;;  %v498_v11 = vshrl.u32 %v1280_v48, 16  ;;  %v521_v13 = vshll.u32 %v1284_v10, 16 }
 0x19c   :  { %vm606_vm14 = vcmp.gt.s32.totalorder %v605_v36, 0  ;;  %vm523_vm1 = vc.u32 %v515_v54, %v519_v49  ;;  %v1297_v8 = vand.u32 65535, %v1286_v55  ;;  %v499_v12 = vshll.u32 %v1288_v59, 16 }
 0x19d   :  { %v607_v0 = vsel %vm606_vm14, %v605_v36, 0  ;;  %vm501_vm15 = vc.u32 %v493_v56, %v497_v60  ;;  %v503_v63 = vadd.s32 %v497_v60, %v493_v56  ;;  %v524_v20 = vsel %vm523_vm1, 1, %v889_v45 }
 0x19e   :  { %v609_v1 = vand.u32 31, %v607_v0  ;;  %v502_v5 = vsel %vm501_vm15, 1, %v889_v45  ;;  %v1302_v14 = vshrl.u32 %v607_v0, 5  ;;  %v525_v22 = vadd.s32 %v519_v49, %v515_v54 }
 0x19f   :  { %v504_v17 = vadd.s32 %v502_v5, %v496_v4  ;;  %vm505_vm2 = vc.u32 %v503_v63, %v499_v12  ;;  %v645_v41 = vshrl.u32 %v1286_v55, 16  ;;  %v526_v35 = vadd.s32 %v524_v20, %v518_v7 }
 0x1a0   :  { %v610_v27 = vsub.s32 32, %v609_v1  ;;  %v612_v19 = vshll.u32 %v883_v38, %v609_v1  ;;  %v615_v44 = vshll.u32 %v884_v40, %v609_v1  ;;  %v618_v28 = vshll.u32 %v885_v42, %v609_v1 }
 0x1a1   :  { %v621_v30 = vshll.u32 %v886_v47, %v609_v1  ;;  %v624_v37 = vshll.u32 %v887_v50, %v609_v1  ;;  %vm627_vm3 = vcmp.lt.s32.totalorder %v1302_v14, 1  ;;  %vm630_vm4 = vcmp.lt.s32.totalorder %v1302_v14, 4 }
 0x1a2   :  { %v613_v23 = vshrl.u32 %v884_v40, %v610_v27  ;;  %v616_v24 = vshrl.u32 %v885_v42, %v610_v27  ;;  %v619_v6 = vshrl.u32 %v886_v47, %v610_v27  ;;  %v622_v31 = vshrl.u32 %v887_v50, %v610_v27 }
 0x1a3   :  { %v625_v51 = vshrl.u32 %v888_v53, %v610_v27  ;;  %v506_v40 = vsel %vm505_vm2, 1, %v889_v45  ;;  %vm527_vm5 = vc.u32 %v525_v22, %v521_v13  ;;  %vm629_vm6 = vcmp.lt.s32.totalorder %v1302_v14, 3 }
 0x1a4   :  { %v1315_v18 = vor.u32 %v613_v23, %v612_v19  ;;  %v1317_v34 = vor.u32 %v616_v24, %v615_v44  ;;  %v620_v29 = vor.u32 %v619_v6, %v618_v28  ;;  %v623_v3 = vor.u32 %v622_v31, %v621_v30 }
 0x1a5   :  { %v626_v15 = vor.u32 %v625_v51, %v624_v37  ;;  %v508_v42 = vadd.s32 %v506_v40, %v504_v17  ;;  %vm628_vm7 = vcmp.lt.s32.totalorder %v1302_v14, 2  ;;  %v528_v49 = vsel %vm527_vm5, 1, %v889_v45 }
 0x1a6   :  { %v635_v47 = vsel %vm627_vm3, %v1315_v18, %v1317_v34  ;;  %v639_v50 = vsel %vm627_vm3, %v1317_v34, %v620_v29  ;;  %v636_v53 = vsel %vm630_vm4, %v623_v3, 920167782  ;;  %v479_v60 = vsel %vm473_vm13, %v476_v61, %v478_v25 }
 0x1a7   :  { %v640_v39 = vsel %vm630_vm4, %v626_v15, 1326507024  ;;  %v637_v43 = vsel %vm629_vm6, %v620_v29, %v636_v53  ;;  %v509_v48 = vadd.s32 %v508_v42, %v498_v11  ;;  %v500_v0 = vshrl.u32 %v1288_v59, 16 }
 0x1a8   :  { %v641_v57 = vsel %vm629_vm6, %v623_v3, %v640_v39  ;;  %v638_v21 = vsel %vm628_vm7, %v635_v47, %v637_v43  ;;  %v520_v63 = vshrl.u32 %v1275_v33, 16  ;;  %v522_v5 = vshrl.u32 %v1284_v10, 16 }
 0x1a9   :  { %v642_v46 = vsel %vm628_vm7, %v639_v50, %v641_v57  ;;  %v668_v54 = vand.u32 65535, %v638_v21  ;;  %v669_v56 = vshrl.u32 %v638_v21, 16  ;;  %v530_v7 = vadd.s32 %v528_v49, %v526_v35 }
 0x1aa   :  { %v646_v36 = vand.u32 65535, %v642_v46  ;;  %v647_v52 = vshrl.u32 %v642_v46, 16  ;;  %v611_v11 = vshrl.u32 %v883_v38, %v610_v27  ;;  %v632_v12 = vsel %vm630_vm4, %v620_v29, 2102212464 }
 0x1ab   :  { %v671_v17 = vmul.u32 %v669_v56, %v1297_v8  ;;  %v672_v20 = vmul.u32 %v668_v54, %v645_v41  ;;  %v1356_v59 = vadd.s32 %v509_v48, %v500_v0  ;;  %v1358_v33 = vadd.s32 %v525_v22, %v521_v13 }
 0x1ac   :  { %v649_v1 = vmul.u32 %v647_v52, %v1297_v8  ;;  %v650_v4 = vmul.u32 %v646_v36, %v645_v41  ;;  %v648_v62 = vmul.u32 %v646_v36, %v1297_v8  ;;  %v651_v25 = vmul.u32 %v647_v52, %v645_v41  ;;  %v798_v52 = vld [vmem:[%s1508_s5 + $0x70] sm:$0xff] }
 0x1ad   :  { %v670_v19 = vmul.u32 %v668_v54, %v1297_v8  ;;  %v673_v10 = vmul.u32 %v669_v56, %v645_v41  ;;  %v674_v44 = vshll.u32 %v671_v17, 16  ;;  %v531_v27 = vadd.s32 %v530_v7, %v520_v63 }
 0x1ae   :  { %v652_v61 = vshll.u32 %v649_v1, 16  ;;  %v654_v23 = vshll.u32 %v650_v4, 16  ;;  %v676_v28 = vshll.u32 %v672_v20, 16  ;;  %vm535_vm13 = vc.u32 %v1356_v59, %v1358_v33 }
 0x1af   :  { %vm678_vm9 = vc.u32 %v670_v19, %v674_v44  ;;  %v680_v6 = vadd.s32 %v674_v44, %v670_v19  ;;  %v532_v13 = vadd.s32 %v531_v27, %v522_v5  ;;  %v653_v8 = vshrl.u32 %v649_v1, 16  ;;  %v795_v5 = vld [vmem:[%s1508_s5 + $0x58] sm:$0xff]  ;;  %v792_v19 = vld [vmem:[%s1508_s5 + $0x40] sm:$0xff] }
 0x1b0   :  { %vm656_vm8 = vc.u32 %v648_v62, %v652_v61  ;;  %v658_v38 = vadd.s32 %v652_v61, %v648_v62  ;;  %v679_v31 = vsel %vm678_vm9, 1, %v889_v45  ;;  %v631_v3 = vsel %vm627_vm3, %v611_v11, %v1315_v18  ;;  %v793_v62 = vld [vmem:[%s1508_s5 + $0x48] sm:$0xff] }
 0x1b1   :  { %v657_v24 = vsel %vm656_vm8, 1, %v889_v45  ;;  %v681_v37 = vadd.s32 %v679_v31, %v673_v10  ;;  %vm682_vm12 = vc.u32 %v680_v6, %v676_v28  ;;  %v536_v40 = vadd.s32 1, %v532_v13 }
 0x1b2   :  { %v659_v30 = vadd.s32 %v657_v24, %v651_v25  ;;  %vm660_vm11 = vc.u32 %v658_v38, %v654_v23  ;;  %v683_v29 = vsel %vm682_vm12, 1, %v889_v45  ;;  %v675_v15 = vshrl.u32 %v671_v17, 16  ;;  %v791_v23 = vld [vmem:[%s1508_s5 + $0x38] sm:$0xff] }
 0x1b3   :  { %v661_v22 = vsel %vm660_vm11, 1, %v889_v45  ;;  %v685_v42 = vadd.s32 %v683_v29, %v681_v37  ;;  %v533_v47 = vmul.u32 %v1252_v26, %v479_v60  ;;  %v633_v50 = vsel %vm629_vm6, %v1317_v34, %v632_v12  ;;  %v799_v26 = vld [vmem:[%s1508_s5 + $0x78] sm:$0xff]  ;;  %v797_v60 = vld [vmem:[%s1508_s5 + $0x68] sm:$0xff]  ;;  %v794_v12 = vld [vmem:[%s1508_s5 + $0x50] sm:$0xff] }
 0x1b4   :  { %v663_v51 = vadd.s32 %v661_v22, %v659_v30  ;;  %v655_v53 = vshrl.u32 %v650_v4, 16  ;;  %v537_v41 = vsel %vm535_vm13, %v536_v40, %v532_v13  ;;  %v677_v43 = vshrl.u32 %v672_v20, 16  ;;  %804 = vmatpush.msra.mxu2 %v799_v26  ;;  %v789_v22 = vld [vmem:[%s1508_s5 + $0x28] sm:$0xff] }
 0x1b5   :  { %v686_v57 = vadd.s32 %v685_v42, %v675_v15  ;;  %v538_v35 = vadd.s32 %v537_v41, %v533_v47  ;;  %v684_v21 = vadd.s32 %v680_v6, %v676_v28  ;;  %v634_v46 = vsel %vm628_vm7, %v631_v3, %v633_v50  ;;  %v790_v6 = vld [vmem:[%s1508_s5 + $0x30] sm:$0xff]  ;;  %v787_v15 = vld [vmem:[%s1508_s5 + $0x18] sm:$0xff]  ;;  %v785_v41 = vld [vmem:[%s1508_s5 + $0x8] sm:$0xff] }
 0x1b6   :  { %v664_v39 = vadd.s32 %v663_v51, %v653_v8  ;;  %v688_v36 = vmul.u32 %v1286_v55, %v634_v46  ;;  %805 = vmatpush.msra.mxu2 %v798_v52  ;;  %v796_v55 = vld [vmem:[%s1508_s5 + $0x60] sm:$0xff]  ;;  %v534_v38 = vadd.s32 %v1358_v33, %v1356_v59  ;;  %v786_v42 = vld [vmem:[%s1508_s5 + $0x10] sm:$0xff]  ;;  %vm442_vm4 = vcmp.lt.s32.totalorder %v1226_v9, 0 }
 0x1b7   :  { %v687_v18 = vadd.s32 %v686_v57, %v677_v43  ;;  %v539_v48 = vadd.s32 536870912, %v538_v35  ;;  %v788_v8 = vld [vmem:[%s1508_s5 + $0x20] sm:$0xff]  ;;  %vm441_vm5 = vcmp.le.f32.partialorder %v1230_v58, 0.7853982  ;;  %vm597_vm6 = vcmp.lt.s32.totalorder %v1263_v32, 0 }
 0x1b8   :  { %v665_v45 = vadd.s32 %v664_v39, %v655_v53  ;;  %806 = vmatpush.msra.mxu2 %v797_v60  ;;  %vm596_vm7 = vcmp.le.f32.partialorder %v1268_v2, 0.7853982  ;;  %879 = vtanh.f32 %v1226_v9  ;;  %vm758_vm11 = vcmp.ge.s32.totalorder %v1180_v16, 16 }
 0x1b9   :  { %v691_v49 = vadd.s32 1, %v687_v18  ;;  %v1379_v34 = vshrl.u32 %v539_v48, 30  ;;  %vm772_vm13 = vcmp.lt.s32.totalorder %v1180_v16, 48  ;;  %881 = vtanh.f32 %v1263_v32 }
 0x1ba   :  { %vm690_vm14 = vc.u32 %v665_v45, %v684_v21  ;;  %807 = vmatpush.msra.mxu2 %v796_v55  ;;  %v689_v29 = vadd.s32 %v684_v21, %v665_v45  ;;  %v784_v21 = vld [vmem:[%s1508_s5] sm:$0xff] }
 0x1bb   :  { %v692_v54 = vsel %vm690_vm14, %v691_v49, %v687_v18  ;;  %v541_v14 = vshll.u32 %v1379_v34, 30  ;;  %v564_v52 = vsub.s32 4, %v1379_v34  ;;  %vm750_vm14 = vcmp.lt.s32.totalorder %v1180_v16, 16 }
 0x1bc   :  { %v693_v56 = vadd.s32 %v692_v54, %v688_v36  ;;  %808 = vmatpush.msra.mxu2 %v795_v5 }
 0x1bd   :  { %v542_v0 = vsub.s32 %v538_v35, %v541_v14 }
 0x1be   :  { %v694_v63 = vadd.s32 536870912, %v693_v56  ;;  %809 = vmatpush.msra.mxu2 %v794_v12 }
 0x1bf   :  { %vm543_vm15 = vcmp.lt.s32.totalorder %v542_v0, 0  ;;  %v544_v1 = vsub.s32 0, %v542_v0 }
 0x1c0   :  { %v1392_v4 = vshrl.u32 %v694_v63, 30  ;;  %810 = vmatpush.msra.mxu2 %v793_v62 }
 0x1c1   :  { %v545_v7 = vsel %vm543_vm15, %v544_v1, %v542_v0  ;;  %vm583_vm15 = vweird.f32 %v1226_v9 }
 0x1c2   :  { %v696_v11 = vshll.u32 %v1392_v4, 30  ;;  %v546_v17 = vclz %v545_v7  ;;  %811 = vmatpush.msra.mxu2 %v792_v19  ;;  %v719_v5 = vsub.s32 4, %v1392_v4 }
 0x1c4   :  { %v697_v20 = vsub.s32 %v693_v56, %v696_v11  ;;  %v840_v61 = vadd.s32 4294967294, %v546_v17  ;;  %812 = vmatpush.msra.mxu2 %v791_v23  ;;  %v720_v19 = vsel %vm597_vm6, %v719_v5, %v1392_v4 }
 0x1c6   :  { %vm698_vm1 = vcmp.lt.s32.totalorder %v697_v20, 0  ;;  %v699_v25 = vsub.s32 0, %v697_v20  ;;  %vm841_vm2 = vcmp.lt.s32.totalorder %v840_v61, 0  ;;  %813 = vmatpush.msra.mxu2 %v790_v6  ;;  %v722_v6 = vsel %vm596_vm7, 0, %v720_v19 }
 0x1c7   :  { %v549_v10 = vsel %vm841_vm2, 0, %v840_v61  ;;  %v739_v4 = vadd.s32 3, %v722_v6  ;;  %vm1471_vm2 = vmand %vm388_vm10, %vm772_vm13 }
 0x1c8   :  { %v700_v44 = vsel %vm698_vm1, %v699_v25, %v697_v20  ;;  %v550_v27 = vsub.s32 32, %v549_v10  ;;  %v554_v28 = vsub.s32 4294967266, %v549_v10  ;;  %v551_v37 = vshll.u32 %v542_v0, %v549_v10  ;;  %814 = vmatpush.msra.mxu2 %v789_v22  ;;  %vm1464_vm1 = vmand %vm758_vm11, %vm380_vm0 }
 0x1c9   :  { %v701_v24 = vclz %v700_v44  ;;  %v565_v0 = vsel %vm442_vm4, %v564_v52, %v1379_v34 }
 0x1ca   :  { %v552_v30 = vshrl.u32 %v534_v38, %v550_v27  ;;  %v555_v13 = vadd.s32 127, %v554_v28  ;;  %815 = vmatpush.msra.mxu2 %v788_v8 }
 0x1cb   :  { %v843_v31 = vadd.s32 4294967294, %v701_v24 }
 0x1cc   :  { %v556_v59 = vshll.u32 %v555_v13, 23  ;;  %v553_v51 = vor.u32 %v552_v30, %v551_v37  ;;  %816 = vmatpush.msra.mxu2 %v787_v15  ;;  %v876_v13 = vpop.eup %875 }
 0x1cd   :  { %vm844_vm3 = vcmp.lt.s32.totalorder %v843_v31, 0 }
 0x1ce   :  { %v704_v33 = vsel %vm844_vm3, 0, %v843_v31  ;;  %v557_v47 = vor.u32 4788187, %v556_v59  ;;  %v560_v57 = vcvt.s32.f32 %v553_v51  ;;  %817 = vmatpush.msra.mxu2 %v786_v42 }
 0x1cf   :  { %v705_v40 = vsub.s32 32, %v704_v33  ;;  %v709_v3 = vsub.s32 4294967266, %v704_v33  ;;  %v706_v50 = vshll.u32 %v697_v20, %v704_v33  ;;  %v567_v20 = vsel %vm441_vm5, 0, %v565_v0 }
 0x1d0   :  { %v558_v43 = vand.u32 2147483647, %v557_v47  ;;  %818 = vmatpush.msra.mxu2 %v785_v41  ;;  %v584_v23 = vadd.s32 3, %v567_v20 }
 0x1d1   :  { %v707_v53 = vshrl.u32 %v689_v29, %v705_v40  ;;  %v710_v39 = vadd.s32 127, %v709_v3  ;;  %v767_v40 = vmul.f32 0.6931472, %v876_v13 }
 0x1d2   :  { %v561_v46 = vmul.f32 %v560_v57, %v558_v43  ;;  %819 = vmatpush.msra.mxu2 %v784_v21  ;;  %v585_v37 = vand.u32 3, %v584_v23 }
 0x1d3   :  { %v708_v35 = vor.u32 %v707_v53, %v706_v50  ;;  %v711_v45 = vshll.u32 %v710_v39, 23  ;;  %v740_v50 = vand.u32 3, %v739_v4  ;;  %v878_v39 = vpop.eup %877 }
 0x1d4   :  { %v562_v48 = vxor.u32 2147483648, %v561_v46  ;;  %vm586_vm8 = vcmp.lt.s32.totalorder %v585_v37, 2  ;;  %vm587_vm9 = vcmp.eq.s32.totalorder %v585_v37, 0  ;;  %vm590_vm12 = vcmp.eq.s32.totalorder %v585_v37, 2 }
 0x1d5   :  { %v712_v18 = vor.u32 4788187, %v711_v45  ;;  %v715_v49 = vcvt.s32.f32 %v708_v35  ;;  %vm742_vm0 = vcmp.eq.s32.totalorder %v740_v50, 0  ;;  %vm745_vm3 = vcmp.eq.s32.totalorder %v740_v50, 2 }
 0x1d6   :  { %v563_v36 = vsel %vm442_vm4, %v562_v48, %v561_v46  ;;  %v869_v46 = vld [vmem:[%s1506_s4] ss:$0 sm:$0xff]  ;;  %v769_v52 = vmul.f32 0.6931472, %v878_v39  ;;  %vm741_vm10 = vcmp.lt.s32.totalorder %v740_v50, 2  ;;  %vm738_vm4 = vweird.f32 %v1263_v32 }
 0x1d7   :  { %v713_v26 = vand.u32 2147483647, %v712_v18  ;;  %v566_v14 = vsel %vm441_vm5, %v1226_v9, %v563_v36  ;;  %v880_v18 = vpop.eup %879 }
 0x1d8   :  { %v568_v56 = vmul.f32 %v566_v14, %v566_v14 }
 0x1d9   :  { %v716_v54 = vmul.f32 %v715_v49, %v713_v26  ;;  %v770_v49 = vmul.f32 2.0, %v767_v40 }
 0x1da   :  { %v569_v63 = vmul.f32 -0.001358992, %v568_v56  ;;  %v576_v55 = vmul.f32 -0.00019511016, %v568_v56 }
 0x1db   :  { %v717_v60 = vxor.u32 2147483648, %v716_v54 }
 0x1dc   :  { %v570_v11 = vadd.f32 0.041655596, %v569_v63  ;;  %v577_v12 = vadd.f32 0.008332121, %v576_v55  ;;  %v882_v55 = vpop.eup %881 }
 0x1dd   :  { %v718_v1 = vsel %vm597_vm6, %v717_v60, %v716_v54 }
 0x1de   :  { %v721_v7 = vsel %vm596_vm7, %v1263_v32, %v718_v1  ;;  %v571_v34 = vmul.f32 %v570_v11, %v568_v56  ;;  %v578_v62 = vmul.f32 %v577_v12, %v568_v56  ;;  %v771_v1 = vmul.f32 2.0, %v769_v52  ;;  %v870_v12 = vld [vmem:[%s1507_s6] ss:$0 sm:$0xff] }
 0x1df   :  { %v723_v17 = vmul.f32 %v721_v7, %v721_v7 }
 0x1e0   :  { %v572_v10 = vadd.f32 -0.4999988, %v571_v34  ;;  %v579_v44 = vadd.f32 -0.16666654, %v578_v62 }
 0x1e1   :  { %v731_v61 = vmul.f32 -0.00019511016, %v723_v17  ;;  %v724_v25 = vmul.f32 -0.001358992, %v723_v17 }
 0x1e2   :  { %v573_v24 = vmul.f32 %v572_v10, %v568_v56  ;;  %v580_v28 = vmul.f32 %v579_v44, %v568_v56 }
 0x1e3   :  { %v732_v38 = vadd.f32 0.008332121, %v731_v61  ;;  %v725_v27 = vadd.f32 0.041655596, %v724_v25 }
 0x1e4   :  { %v574_v58 = vadd.f32 1.0, %v573_v24  ;;  %v581_v22 = vadd.f32 1.0, %v580_v28 }
 0x1e5   :  { %v733_v30 = vmul.f32 %v732_v38, %v723_v17  ;;  %v726_v31 = vmul.f32 %v725_v27, %v723_v17 }
 0x1e6   :  { %v582_v8 = vmul.f32 %v581_v22, %v566_v14  ;;  %v591_v51 = vxor.u32 2147483648, %v574_v58 }
 0x1e7   :  { %v734_v59 = vadd.f32 -0.16666654, %v733_v30  ;;  %v727_v33 = vadd.f32 -0.4999988, %v726_v31 }
 0x1e8   :  { %v588_v15 = vxor.u32 2147483648, %v582_v8  ;;  %v592_v53 = vsel %vm590_vm12, %v591_v51, %v582_v8 }
 0x1e9   :  { %v735_v29 = vmul.f32 %v734_v59, %v723_v17  ;;  %v728_v3 = vmul.f32 %v727_v33, %v723_v17 }
 0x1ea   :  { %v589_v2 = vsel %vm587_vm9, %v574_v58, %v588_v15 }
 0x1eb   :  { %v736_v42 = vadd.f32 1.0, %v735_v29  ;;  %v729_v47 = vadd.f32 1.0, %v728_v3  ;;  %v593_v43 = vsel %vm586_vm8, %v589_v2, %v592_v53 }
 0x1ec   :  { %v594_v45 = vsel %vm583_vm15, nan, %v593_v43 }
 0x1ed   :  { %v737_v41 = vmul.f32 %v736_v42, %v721_v7  ;;  %v746_v35 = vxor.u32 2147483648, %v729_v47  ;;  %v754_v26 = vsel %vm750_vm14, %v594_v45, %v1226_v9 }
 0x1ee   :  { %v762_v36 = vsel %vm1464_vm1, %v880_v18, %v754_v26 }
 0x1ef   :  { %v743_v48 = vxor.u32 2147483648, %v737_v41  ;;  %v776_v54 = vsel %vm1471_vm2, %v770_v49, %v762_v36  ;;  %v747_v56 = vsel %vm745_vm3, %v746_v35, %v737_v41 }
 0x1f0   :  { %v782_v60 = vmul.f32 %v869_v46, %v776_v54 }
 0x1f1   :  { %v744_v14 = vsel %vm742_vm0, %v729_v47, %v743_v48 }
 0x1f2   :  { %v748_v0 = vsel %vm741_vm10, %v744_v14, %v747_v56  ;;  %820 = vmatmul.f32.vlgmr.msra.gmra.mxu2 %v782_v60 }
 0x1f3   :  { %v749_v63 = vsel %vm738_vm4, nan, %v748_v0 }
 0x1f4   :  { %v755_v9 = vsel %vm750_vm14, %v749_v63, %v1263_v32 }
 0x1f5   :  { %v763_v5 = vsel %vm1464_vm1, %v882_v55, %v755_v9 }
 0x1f6   :  { %v777_v7 = vsel %vm1471_vm2, %v771_v1, %v763_v5 }
 0x1f7   :  { %v783_v11 = vmul.f32 %v869_v46, %v777_v7 }
 0x1fa   :  { %823 = vmatmul.f32.gmra.mxu2 %v783_v11 }
 0x275   :  { %v821_v17 = vpop.f32.mrf.mxu2 }
 0x276   :  { %v822_v20 = vadd.f32 %v870_v12, %v821_v17 }
 0x278   :  { %827 = vst [vmem:[%s1509_s7] sm:$0xff] %v822_v20 }
 0x27d   :  { %v824_v16 = vpop.f32.mrf.mxu2 }
 0x27e   :  { %v825_v32 = vadd.f32 %v870_v12, %v824_v16 }
 0x280   :  { %828 = vst [vmem:[%s1509_s7 + $0x8] sm:$0xff] %v825_v32 }

</bundles_post_ra>
